<compile_context>
chip_gen: v5e
topology: v5e:2x2
jax: 0.10.0
libtpu: 0.0.40
codegen_flags: <defaults>
</compile_context>

<pallas_src>
import math
import functools

import jax
import jax.numpy as jnp
from jax import lax
from jax.experimental import pallas as pl
from jax.experimental.pallas import tpu as pltpu


_F32_MIN = float(jnp.finfo(jnp.float32).min)


# -----------------------------------------------------------------------------
# Small helpers: tile fitting and scoped-VMEM budgeting.
# -----------------------------------------------------------------------------
def _ceil_to(x, m):
    return -(-x // m) * m


def _fit_tile(n, target, multiple=8):
    """Largest tile <= target that is either the full extent or a multiple of 8."""
    if n <= target:
        return n
    return max((target // multiple) * multiple, multiple)


def _padded_bytes(shape, itemsize=4):
    """f32 VMEM footprint of a block, padded to (8, 128) tiles on the last 2 dims."""
    shape = tuple(int(d) for d in shape)
    if len(shape) == 1:
        shape = (1,) + shape
    lead = 1
    for d in shape[:-2]:
        lead *= d
    return lead * _ceil_to(shape[-2], 8) * _ceil_to(shape[-1], 128) * itemsize


def _vmem_limit_bytes(streamed, resident):
    """2x per streamed block (double-buffering), 1x per resident block,
    then 2x overall headroom + 2 MiB slack, clamped to [8 MiB, 64 MiB]."""
    need = (sum(2 * _padded_bytes(s) for s in streamed)
            + sum(_padded_bytes(s) for s in resident))
    return int(min(max(2 * need + (2 << 20), 8 << 20), 64 << 20))


# -----------------------------------------------------------------------------
# Kernel 1: generic row-tiled linear (x @ W^T + b), weights VMEM-resident.
# Used for the Q / K / V input projections and the output projection.
# -----------------------------------------------------------------------------
def _linear_kernel(x_ref, w_ref, b_ref, o_ref):
    o_ref[...] = (jnp.dot(x_ref[...], w_ref[...],
                          preferred_element_type=jnp.float32)
                  + b_ref[...]).astype(o_ref.dtype)


def pallas_linear(x, wT, b2, *, tm_target=256):
    M, Din = x.shape
    Dout = wT.shape[1]
    tm = _fit_tile(M, tm_target)
    grid = (pl.cdiv(M, tm),)
    vmem = _vmem_limit_bytes(
        streamed=[(tm, Din), (tm, Dout)],        # x row-block, out row-block
        resident=[(Din, Dout), (1, Dout)])       # weight, bias
    return pl.pallas_call(
        _linear_kernel,
        grid=grid,
        in_specs=[pl.BlockSpec((tm, Din), lambda i: (i, 0)),
                  pl.BlockSpec((Din, Dout), lambda i: (0, 0)),   # resident
                  pl.BlockSpec((1, Dout), lambda i: (0, 0))],    # resident
        out_specs=pl.BlockSpec((tm, Dout), lambda i: (i, 0)),
        out_shape=jax.ShapeDtypeStruct((M, Dout), x.dtype),
        compiler_params=pltpu.CompilerParams(
            dimension_semantics=("parallel",),
            vmem_limit_bytes=vmem),
    )(x, wT, b2)


# -----------------------------------------------------------------------------
# Kernel 2: flash-style attention, one (batch*head, q-tile) per parallel grid
# point, online softmax over k-tiles (last, "arbitrary" axis).
# -----------------------------------------------------------------------------
def _flash_attn_kernel(q_ref, k_ref, v_ref, o_ref, m_sc, l_sc, acc_sc, *,
                       causal, tq, tk, lk):
    ki = pl.program_id(2)

    @pl.when(ki == 0)
    def _():
        m_sc[...] = jnp.full_like(m_sc, -jnp.inf)
        l_sc[...] = jnp.zeros_like(l_sc)
        acc_sc[...] = jnp.zeros_like(acc_sc)

    q = q_ref[0]                                   # (tq, qh)
    k = k_ref[0]                                   # (tk, kh)
    v = v_ref[0]                                   # (tk, kh)
    # QK^T on the MXU, contracting the last dims of both (no in-kernel .T).
    s = lax.dot_general(q, k, (((1,), (1,)), ((), ())),
                        preferred_element_type=jnp.float32)   # (tq, tk)

    ragged_k = (lk % tk) != 0
    if causal or ragged_k:
        col = lax.broadcasted_iota(jnp.int32, (tq, tk), 1) + ki * tk
    if ragged_k:
        oob = col >= lk
        s = jnp.where(oob, _F32_MIN, s)            # keep padded k columns sane
    if causal:
        row = lax.broadcasted_iota(jnp.int32, (tq, tk), 0) + pl.program_id(1) * tq
        # PyTorch quirk: masked_fill(tril(ones), -inf).nan_to_num() masks the
        # lower triangle INCLUDING the diagonal with f32 min.
        s = jnp.where(col <= row, _F32_MIN, s)

    m_prev = m_sc[...]
    m_new = jnp.maximum(m_prev, jnp.max(s, axis=-1, keepdims=True))
    alpha = jnp.exp(m_prev - m_new)
    p = jnp.exp(s - m_new)
    if ragged_k:
        p = jnp.where(oob, 0.0, p)                 # drop padded columns' mass
    l_sc[...] = alpha * l_sc[...] + jnp.sum(p, axis=-1, keepdims=True)
    acc_sc[...] = alpha * acc_sc[...] + jnp.dot(p.astype(v.dtype), v,
                                                preferred_element_type=jnp.float32)
    m_sc[...] = m_new

    @pl.when(ki == pl.num_programs(2) - 1)
    def _():
        o_ref[0] = (acc_sc[...] *
                    pl.reciprocal(l_sc[...], approx=True)).astype(o_ref.dtype)


def pallas_flash_attention(qh, kh, vh, causal, *, tq_target=256, tk_target=256):
    BH, Lq, qd = qh.shape
    _, Lk, kd = kh.shape
    tq = _fit_tile(Lq, tq_target)
    tk = _fit_tile(Lk, tk_target)
    grid = (BH, pl.cdiv(Lq, tq), pl.cdiv(Lk, tk))
    kern = functools.partial(_flash_attn_kernel, causal=causal,
                             tq=tq, tk=tk, lk=Lk)
    vmem = _vmem_limit_bytes(
        streamed=[(1, tq, qd), (1, tk, kd), (1, tk, kd), (1, tq, kd)],
        resident=[(tq, 1), (tq, 1), (tq, kd), (tq, tk)])
    return pl.pallas_call(
        kern,
        grid=grid,
        in_specs=[pl.BlockSpec((1, tq, qd), lambda b, i, j: (b, i, 0)),
                  pl.BlockSpec((1, tk, kd), lambda b, i, j: (b, j, 0)),
                  pl.BlockSpec((1, tk, kd), lambda b, i, j: (b, j, 0))],
        out_specs=pl.BlockSpec((1, tq, kd), lambda b, i, j: (b, i, 0)),
        out_shape=jax.ShapeDtypeStruct((BH, Lq, kd), qh.dtype),
        scratch_shapes=[pltpu.VMEM((tq, 1), jnp.float32),    # running max m
                        pltpu.VMEM((tq, 1), jnp.float32),    # running sum l
                        pltpu.VMEM((tq, kd), jnp.float32)],  # accumulator
        compiler_params=pltpu.CompilerParams(
            dimension_semantics=("parallel", "parallel", "arbitrary"),
            vmem_limit_bytes=vmem),
    )(qh, kh, vh)


# -----------------------------------------------------------------------------
# Module
# -----------------------------------------------------------------------------
class MultiheadAttentionPallas:
    def __init__(self, head_num, q_length, k_length, q_dim, k_dim, v_dim,
                 is_masked=False, key=None):
        if key is None:
            key = jax.random.PRNGKey(0)
        assert q_dim % head_num == 0 and k_dim % head_num == 0
        self.head_num = head_num
        self.q_length = q_length
        self.k_length = k_length
        self.q_dim = q_dim
        self.k_dim = k_dim
        self.v_dim = v_dim
        self.qh_dim = q_dim // head_num
        self.kh_dim = k_dim // head_num
        self.is_masked = is_masked
        # The raw torch .view() of the value projection requires:
        assert v_dim == head_num * self.kh_dim, \
            "v_dim must equal head_num * (k_dim // head_num) for the .view()"

        def init_linear(k, out_f, in_f):
            kw, kb = jax.random.split(k)
            bound = 1.0 / math.sqrt(in_f)   # PyTorch nn.Linear default init
            w = jax.random.uniform(kw, (out_f, in_f), jnp.float32, -bound, bound)
            b = jax.random.uniform(kb, (out_f,), jnp.float32, -bound, bound)
            return w, b

        kq, kk, kv, ko = jax.random.split(key, 4)
        self.Wq, self.bq = init_linear(kq, q_dim, q_dim)
        self.Wk, self.bk = init_linear(kk, k_dim, k_dim)
        self.Wv, self.bv = init_linear(kv, v_dim, v_dim)
        self.Wo, self.bo = init_linear(ko, v_dim, self.kh_dim * head_num)

        # Pre-transpose weights once (kernels do x @ W^T via x @ WT, no in-kernel
        # transpose), reshape biases to (1, D) for 2D VMEM blocks, and fold the
        # 1/sqrt(head_num) attention scale into the Q projection.
        inv_scale = 1.0 / math.sqrt(head_num)   # torch: scale = sqrt(head_num)
        self.WqT_s = self.Wq.T * inv_scale
        self.bq_s = (self.bq * inv_scale).reshape(1, -1)
        self.WkT, self.bk2 = self.Wk.T, self.bk.reshape(1, -1)
        self.WvT, self.bv2 = self.Wv.T, self.bv.reshape(1, -1)
        self.WoT, self.bo2 = self.Wo.T, self.bo.reshape(1, -1)

    def __call__(self, query, key, value):
        B = query.shape[0]
        H, Lq, Lk = self.head_num, self.q_length, self.k_length

        # Row-tiled, pipelined projections over collapsed (B*L, D) rows.
        qp = pallas_linear(query.reshape(B * Lq, self.q_dim), self.WqT_s, self.bq_s)
        kp = pallas_linear(key.reshape(B * Lk, self.k_dim), self.WkT, self.bk2)
        vp = pallas_linear(value.reshape(B * Lk, self.v_dim), self.WvT, self.bv2)

        # Raw torch .view() head split (row-major reshape; free outside kernels).
        qh = qp.reshape(B * H, Lq, self.qh_dim)
        kh = kp.reshape(B * H, Lk, self.kh_dim)
        vh = vp.reshape(B * H, Lk, self.kh_dim)

        heads = pallas_flash_attention(qh, kh, vh, self.is_masked)

        # Raw torch .view() head merge, then output projection.
        merged = heads.reshape(B * Lq, H * self.kh_dim)
        out = pallas_linear(merged, self.WoT, self.bo2)
        return out.reshape(B, Lq, self.v_dim)

    # Pure-JAX reference mirroring the PyTorch forward, for verification.
    def reference(self, query, key, value):
        B = query.shape[0]
        H, Lq, Lk = self.head_num, self.q_length, self.k_length
        qp = query @ self.Wq.T + self.bq
        kp = key @ self.Wk.T + self.bk
        vp = value @ self.Wv.T + self.bv
        qh = qp.reshape(B, H, Lq, self.qh_dim)
        kh = kp.reshape(B, H, Lk, self.kh_dim)
        vh = vp.reshape(B, H, Lk, self.kh_dim)
        scale = math.sqrt(H)
        s = jnp.einsum('bhik,bhjk->bhij', qh, kh) / scale
        if self.is_masked:
            row = lax.broadcasted_iota(jnp.int32, (Lq, Lk), 0)
            col = lax.broadcasted_iota(jnp.int32, (Lq, Lk), 1)
            s = jnp.where(col <= row, _F32_MIN, s)
        w = jax.nn.softmax(s, axis=-1)
        heads = jnp.einsum('bhij,bhjv->bhiv', w, vh)
        heads = heads.reshape(B, Lq, H * self.kh_dim)
        return heads @ self.Wo.T + self.bo


# -----------------------------------------------------------------------------
if __name__ == "__main__":
    B = 2
    head_num = 4
    q_length = 8
    k_length = 8
    q_dim = 32
    k_dim = 32
    v_dim = 32  # must equal k_dim for the torch .view() in forward to be valid

    root = jax.random.PRNGKey(0)
    kp0, kp1, kq, kk, kv = jax.random.split(root, 5)

    query = jax.random.normal(kq, (B, q_length, q_dim), jnp.float32)
    key_in = jax.random.normal(kk, (B, k_length, k_dim), jnp.float32)
    value = jax.random.normal(kv, (B, k_length, v_dim), jnp.float32)

    for is_masked, kparam in ((False, kp0), (True, kp1)):
        mha = MultiheadAttentionPallas(head_num, q_length, k_length,
                                       q_dim, k_dim, v_dim,
                                       is_masked=is_masked, key=kparam)
        fwd = jax.jit(mha.__call__)
        out = jax.block_until_ready(fwd(query, key_in, value))
        ref = mha.reference(query, key_in, value)
        assert out.shape == (B, q_length, v_dim)
        # Tolerance slightly loosened vs. the pure-f32 path because the softmax
        # denominator uses the EUP approximate reciprocal (pl.reciprocal approx).
        assert jnp.allclose(out, ref, atol=2e-3, rtol=2e-3), \
            f"mismatch vs JAX reference (is_masked={is_masked})"

    print("KERNEL_OK")
</pallas_src>

<mosaic_0001>
module attributes {stable_mosaic.version = 11 : i64} {
  func.func @_flash_attn_kernel(%arg0: i32, %arg1: i32, %arg2: i32, %arg3: memref<1x8x8xf32, #tpu.memory_space<vmem>>, %arg4: memref<1x8x8xf32, #tpu.memory_space<vmem>>, %arg5: memref<1x8x8xf32, #tpu.memory_space<vmem>>, %arg6: memref<1x8x8xf32, #tpu.memory_space<vmem>>, %arg7: memref<8x1xf32, #tpu.memory_space<vmem>>, %arg8: memref<8x1xf32, #tpu.memory_space<vmem>>, %arg9: memref<8x8xf32, #tpu.memory_space<vmem>>) attributes {dimension_semantics = [#tpu.dimension_semantics<parallel>, #tpu.dimension_semantics<parallel>, #tpu.dimension_semantics<arbitrary>], iteration_bounds = array<i64: 8, 1, 1>, scalar_prefetch = 0 : i64, scratch_operands = 3 : i64, tpu.core_type = #tpu.core_type<tc>, window_params = [{transform_indices = @transform_0, window_bounds = array<i64: 1, 8, 8>}, {transform_indices = @transform_1, window_bounds = array<i64: 1, 8, 8>}, {transform_indices = @transform_2, window_bounds = array<i64: 1, 8, 8>}, {transform_indices = @transform_3, window_bounds = array<i64: 1, 8, 8>}]} {
    %c0_i32 = arith.constant 0 : i32
    %0 = arith.cmpi eq, %arg2, %c0_i32 : i32
    %1 = arith.extui %0 : i1 to i32
    %c0_i32_0 = arith.constant 0 : i32
    %2 = arith.cmpi ne, %1, %c0_i32_0 : i32
    scf.if %2 {
      %cst_26 = arith.constant 0xFF800000 : f32
      %35 = vector.broadcast %cst_26 : f32 to vector<8x1xf32>
      %c0_27 = arith.constant 0 : index
      %c0_28 = arith.constant 0 : index
      %36 = vector.load %arg7[%c0_27, %c0_28] : memref<8x1xf32, #tpu.memory_space<vmem>>, vector<8x1xf32>
      tpu.vector_store %arg7[%c0_27, %c0_28], %35 {strides = array<i32>} : memref<8x1xf32, #tpu.memory_space<vmem>>, vector<8x1xf32>,
      %cst_29 = arith.constant 0.000000e+00 : f32
      %37 = vector.broadcast %cst_29 : f32 to vector<8x1xf32>
      %c0_30 = arith.constant 0 : index
      %c0_31 = arith.constant 0 : index
      %38 = vector.load %arg8[%c0_30, %c0_31] : memref<8x1xf32, #tpu.memory_space<vmem>>, vector<8x1xf32>
      tpu.vector_store %arg8[%c0_30, %c0_31], %37 {strides = array<i32>} : memref<8x1xf32, #tpu.memory_space<vmem>>, vector<8x1xf32>,
      %cst_32 = arith.constant 0.000000e+00 : f32
      %39 = vector.broadcast %cst_32 : f32 to vector<8x8xf32>
      %c0_33 = arith.constant 0 : index
      %c0_34 = arith.constant 0 : index
      %40 = vector.load %arg9[%c0_33, %c0_34] : memref<8x8xf32, #tpu.memory_space<vmem>>, vector<8x8xf32>
      tpu.vector_store %arg9[%c0_33, %c0_34], %39 {strides = array<i32>} : memref<8x8xf32, #tpu.memory_space<vmem>>, vector<8x8xf32>,
    } else {
    }
    %c0 = arith.constant 0 : index
    %c0_1 = arith.constant 0 : index
    %c0_2 = arith.constant 0 : index
    %3 = vector.load %arg3[%c0, %c0_1, %c0_2] : memref<1x8x8xf32, #tpu.memory_space<vmem>>, vector<1x8x8xf32>
    %4 = vector.shape_cast %3 : vector<1x8x8xf32> to vector<8x8xf32>
    %c0_3 = arith.constant 0 : index
    %c0_4 = arith.constant 0 : index
    %c0_5 = arith.constant 0 : index
    %5 = vector.load %arg4[%c0_3, %c0_4, %c0_5] : memref<1x8x8xf32, #tpu.memory_space<vmem>>, vector<1x8x8xf32>
    %6 = vector.shape_cast %5 : vector<1x8x8xf32> to vector<8x8xf32>
    %c0_6 = arith.constant 0 : index
    %c0_7 = arith.constant 0 : index
    %c0_8 = arith.constant 0 : index
    %7 = vector.load %arg5[%c0_6, %c0_7, %c0_8] : memref<1x8x8xf32, #tpu.memory_space<vmem>>, vector<1x8x8xf32>
    %8 = vector.shape_cast %7 : vector<1x8x8xf32> to vector<8x8xf32>
    %cst = arith.constant dense<0.000000e+00> : vector<8x8xf32>
    %9 = tpu.matmul %4, %6, %cst {dimension_numbers = #tpu.dot_dimension_numbers<[1], [1], [0], [0], [0, 0, 1, 0], [], []>} : vector<8x8xf32>, vector<8x8xf32>, vector<8x8xf32> -> vector<8x8xf32>
    %c0_9 = arith.constant 0 : index
    %c0_10 = arith.constant 0 : index
    %10 = vector.load %arg7[%c0_9, %c0_10] : memref<8x1xf32, #tpu.memory_space<vmem>>, vector<8x1xf32>
    %cst_11 = arith.constant dense<0xFF800000> : vector<8xf32>
    %11 = vector.multi_reduction <maximumf>, %9, %cst_11 [1] : vector<8x8xf32> to vector<8xf32>
    %12 = vector.shape_cast %11 : vector<8xf32> to vector<8x1xf32>
    %13 = arith.maximumf %10, %12 : vector<8x1xf32>
    %14 = arith.subf %10, %13 : vector<8x1xf32>
    %15 = math.exp %14 : vector<8x1xf32>
    %16 = vector.broadcast %13 : vector<8x1xf32> to vector<8x8xf32>
    %17 = arith.subf %9, %16 : vector<8x8xf32>
    %18 = math.exp %17 : vector<8x8xf32>
    %c0_12 = arith.constant 0 : index
    %c0_13 = arith.constant 0 : index
    %19 = vector.load %arg8[%c0_12, %c0_13] : memref<8x1xf32, #tpu.memory_space<vmem>>, vector<8x1xf32>
    %20 = arith.mulf %15, %19 : vector<8x1xf32>
    %cst_14 = arith.constant dense<0.000000e+00> : vector<8xf32>
    %21 = vector.multi_reduction <add>, %18, %cst_14 [1] : vector<8x8xf32> to vector<8xf32>
    %22 = vector.shape_cast %21 : vector<8xf32> to vector<8x1xf32>
    %23 = arith.addf %20, %22 : vector<8x1xf32>
    %c0_15 = arith.constant 0 : index
    %c0_16 = arith.constant 0 : index
    %24 = vector.load %arg8[%c0_15, %c0_16] : memref<8x1xf32, #tpu.memory_space<vmem>>, vector<8x1xf32>
    tpu.vector_store %arg8[%c0_15, %c0_16], %23 {strides = array<i32>} : memref<8x1xf32, #tpu.memory_space<vmem>>, vector<8x1xf32>,
    %c0_17 = arith.constant 0 : index
    %c0_18 = arith.constant 0 : index
    %25 = vector.load %arg9[%c0_17, %c0_18] : memref<8x8xf32, #tpu.memory_space<vmem>>, vector<8x8xf32>
    %26 = vector.broadcast %15 : vector<8x1xf32> to vector<8x8xf32>
    %27 = arith.mulf %26, %25 : vector<8x8xf32>
    %cst_19 = arith.constant dense<0.000000e+00> : vector<8x8xf32>
    %28 = tpu.matmul %18, %8, %cst_19 {dimension_numbers = #tpu.dot_dimension_numbers<[1], [0], [0], [1], [0, 0, 1, 1], [], []>} : vector<8x8xf32>, vector<8x8xf32>, vector<8x8xf32> -> vector<8x8xf32>
    %29 = arith.addf %27, %28 : vector<8x8xf32>
    %c0_20 = arith.constant 0 : index
    %c0_21 = arith.constant 0 : index
    %30 = vector.load %arg9[%c0_20, %c0_21] : memref<8x8xf32, #tpu.memory_space<vmem>>, vector<8x8xf32>
    tpu.vector_store %arg9[%c0_20, %c0_21], %29 {strides = array<i32>} : memref<8x8xf32, #tpu.memory_space<vmem>>, vector<8x8xf32>,
    %c0_22 = arith.constant 0 : index
    %c0_23 = arith.constant 0 : index
    %31 = vector.load %arg7[%c0_22, %c0_23] : memref<8x1xf32, #tpu.memory_space<vmem>>, vector<8x1xf32>
    tpu.vector_store %arg7[%c0_22, %c0_23], %13 {strides = array<i32>} : memref<8x1xf32, #tpu.memory_space<vmem>>, vector<8x1xf32>,
    %c0_i32_24 = arith.constant 0 : i32
    %32 = arith.cmpi eq, %arg2, %c0_i32_24 : i32
    %33 = arith.extui %32 : i1 to i32
    %c0_i32_25 = arith.constant 0 : i32
    %34 = arith.cmpi ne, %33, %c0_i32_25 : i32
    scf.if %34 {
      %c0_26 = arith.constant 0 : index
      %c0_27 = arith.constant 0 : index
      %35 = vector.load %arg9[%c0_26, %c0_27] : memref<8x8xf32, #tpu.memory_space<vmem>>, vector<8x8xf32>
      %c0_28 = arith.constant 0 : index
      %c0_29 = arith.constant 0 : index
      %36 = vector.load %arg8[%c0_28, %c0_29] : memref<8x1xf32, #tpu.memory_space<vmem>>, vector<8x1xf32>
      %37 = tpu.reciprocal %36 {approx = true} : vector<8x1xf32> -> vector<8x1xf32>
      %38 = vector.broadcast %37 : vector<8x1xf32> to vector<8x8xf32>
      %39 = arith.mulf %35, %38 : vector<8x8xf32>
      %c0_30 = arith.constant 0 : index
      %c0_31 = arith.constant 0 : index
      %c0_32 = arith.constant 0 : index
      %40 = vector.load %arg6[%c0_30, %c0_31, %c0_32] : memref<1x8x8xf32, #tpu.memory_space<vmem>>, vector<1x8x8xf32>
      %41 = vector.shape_cast %40 : vector<1x8x8xf32> to vector<8x8xf32>
      %42 = vector.shape_cast %39 : vector<8x8xf32> to vector<1x8x8xf32>
      tpu.vector_store %arg6[%c0_30, %c0_31, %c0_32], %42 {strides = array<i32>} : memref<1x8x8xf32, #tpu.memory_space<vmem>>, vector<1x8x8xf32>,
    } else {
    }
    return
  }
  func.func @transform_0(%arg0: i32, %arg1: i32, %arg2: i32) -> (i32, i32, i32) {
    %c0_i32 = arith.constant 0 : i32
    %c0_i32_0 = arith.constant 0 : i32
    return %arg0, %arg1, %c0_i32 : i32, i32, i32
  }
  func.func @transform_1(%arg0: i32, %arg1: i32, %arg2: i32) -> (i32, i32, i32) {
    %c0_i32 = arith.constant 0 : i32
    %c0_i32_0 = arith.constant 0 : i32
    return %arg0, %arg2, %c0_i32 : i32, i32, i32
  }
  func.func @transform_2(%arg0: i32, %arg1: i32, %arg2: i32) -> (i32, i32, i32) {
    %c0_i32 = arith.constant 0 : i32
    %c0_i32_0 = arith.constant 0 : i32
    return %arg0, %arg2, %c0_i32 : i32, i32, i32
  }
  func.func @transform_3(%arg0: i32, %arg1: i32, %arg2: i32) -> (i32, i32, i32) {
    %c0_i32 = arith.constant 0 : i32
    %c0_i32_0 = arith.constant 0 : i32
    return %arg0, %arg1, %c0_i32 : i32, i32, i32
  }
}

module attributes {stable_mosaic.version = 11 : i64} {
  func.func @_linear_kernel(%arg0: i32, %arg1: memref<16x32xf32, #tpu.memory_space<vmem>>, %arg2: memref<32x32xf32, #tpu.memory_space<vmem>>, %arg3: memref<1x32xf32, #tpu.memory_space<vmem>>, %arg4: memref<16x32xf32, #tpu.memory_space<vmem>>) attributes {dimension_semantics = [#tpu.dimension_semantics<parallel>], iteration_bounds = array<i64: 1>, scalar_prefetch = 0 : i64, scratch_operands = 0 : i64, tpu.core_type = #tpu.core_type<tc>, window_params = [{transform_indices = @transform_0, window_bounds = array<i64: 16, 32>}, {pipeline_mode = #tpu.pipeline_mode<synchronous>, transform_indices = @transform_1, window_bounds = array<i64: 32, 32>}, {pipeline_mode = #tpu.pipeline_mode<synchronous>, transform_indices = @transform_2, window_bounds = array<i64: 1, 32>}, {transform_indices = @transform_3, window_bounds = array<i64: 16, 32>}]} {
    %c0 = arith.constant 0 : index
    %c0_0 = arith.constant 0 : index
    %0 = vector.load %arg1[%c0, %c0_0] : memref<16x32xf32, #tpu.memory_space<vmem>>, vector<16x32xf32>
    %c0_1 = arith.constant 0 : index
    %c0_2 = arith.constant 0 : index
    %1 = vector.load %arg2[%c0_1, %c0_2] : memref<32x32xf32, #tpu.memory_space<vmem>>, vector<32x32xf32>
    %cst = arith.constant dense<0.000000e+00> : vector<16x32xf32>
    %2 = tpu.matmul %0, %1, %cst {dimension_numbers = #tpu.dot_dimension_numbers<[1], [0], [0], [1], [0, 0, 1, 1], [], []>} : vector<16x32xf32>, vector<32x32xf32>, vector<16x32xf32> -> vector<16x32xf32>
    %c0_3 = arith.constant 0 : index
    %c0_4 = arith.constant 0 : index
    %3 = vector.load %arg3[%c0_3, %c0_4] : memref<1x32xf32, #tpu.memory_space<vmem>>, vector<1x32xf32>
    %4 = vector.broadcast %3 : vector<1x32xf32> to vector<16x32xf32>
    %5 = arith.addf %2, %4 : vector<16x32xf32>
    %c0_5 = arith.constant 0 : index
    %c0_6 = arith.constant 0 : index
    %6 = vector.load %arg4[%c0_5, %c0_6] : memref<16x32xf32, #tpu.memory_space<vmem>>, vector<16x32xf32>
    tpu.vector_store %arg4[%c0_5, %c0_6], %5 {strides = array<i32>} : memref<16x32xf32, #tpu.memory_space<vmem>>, vector<16x32xf32>,
    return
  }
  func.func @transform_0(%arg0: i32) -> (i32, i32) {
    %c0_i32 = arith.constant 0 : i32
    %c0_i32_0 = arith.constant 0 : i32
    return %arg0, %c0_i32 : i32, i32
  }
  func.func @transform_1(%arg0: i32) -> (i32, i32) {
    %c0_i32 = arith.constant 0 : i32
    %c0_i32_0 = arith.constant 0 : i32
    %c0_i32_1 = arith.constant 0 : i32
    return %c0_i32, %c0_i32_0 : i32, i32
  }
  func.func @transform_2(%arg0: i32) -> (i32, i32) {
    %c0_i32 = arith.constant 0 : i32
    %c0_i32_0 = arith.constant 0 : i32
    %c0_i32_1 = arith.constant 0 : i32
    return %c0_i32, %c0_i32_0 : i32, i32
  }
  func.func @transform_3(%arg0: i32) -> (i32, i32) {
    %c0_i32 = arith.constant 0 : i32
    %c0_i32_0 = arith.constant 0 : i32
    return %arg0, %c0_i32 : i32, i32
  }
}

module attributes {stable_mosaic.version = 11 : i64} {
  func.func @_linear_kernel(%arg0: i32, %arg1: memref<16x32xf32, #tpu.memory_space<vmem>>, %arg2: memref<32x32xf32, #tpu.memory_space<vmem>>, %arg3: memref<1x32xf32, #tpu.memory_space<vmem>>, %arg4: memref<16x32xf32, #tpu.memory_space<vmem>>) attributes {dimension_semantics = [#tpu.dimension_semantics<parallel>], iteration_bounds = array<i64: 1>, scalar_prefetch = 0 : i64, scratch_operands = 0 : i64, tpu.core_type = #tpu.core_type<tc>, window_params = [{transform_indices = @transform_0, window_bounds = array<i64: 16, 32>}, {pipeline_mode = #tpu.pipeline_mode<synchronous>, transform_indices = @transform_1, window_bounds = array<i64: 32, 32>}, {pipeline_mode = #tpu.pipeline_mode<synchronous>, transform_indices = @transform_2, window_bounds = array<i64: 1, 32>}, {transform_indices = @transform_3, window_bounds = array<i64: 16, 32>}]} {
    %c0 = arith.constant 0 : index
    %c0_0 = arith.constant 0 : index
    %0 = vector.load %arg1[%c0, %c0_0] : memref<16x32xf32, #tpu.memory_space<vmem>>, vector<16x32xf32>
    %c0_1 = arith.constant 0 : index
    %c0_2 = arith.constant 0 : index
    %1 = vector.load %arg2[%c0_1, %c0_2] : memref<32x32xf32, #tpu.memory_space<vmem>>, vector<32x32xf32>
    %cst = arith.constant dense<0.000000e+00> : vector<16x32xf32>
    %2 = tpu.matmul %0, %1, %cst {dimension_numbers = #tpu.dot_dimension_numbers<[1], [0], [0], [1], [0, 0, 1, 1], [], []>} : vector<16x32xf32>, vector<32x32xf32>, vector<16x32xf32> -> vector<16x32xf32>
    %c0_3 = arith.constant 0 : index
    %c0_4 = arith.constant 0 : index
    %3 = vector.load %arg3[%c0_3, %c0_4] : memref<1x32xf32, #tpu.memory_space<vmem>>, vector<1x32xf32>
    %4 = vector.broadcast %3 : vector<1x32xf32> to vector<16x32xf32>
    %5 = arith.addf %2, %4 : vector<16x32xf32>
    %c0_5 = arith.constant 0 : index
    %c0_6 = arith.constant 0 : index
    %6 = vector.load %arg4[%c0_5, %c0_6] : memref<16x32xf32, #tpu.memory_space<vmem>>, vector<16x32xf32>
    tpu.vector_store %arg4[%c0_5, %c0_6], %5 {strides = array<i32>} : memref<16x32xf32, #tpu.memory_space<vmem>>, vector<16x32xf32>,
    return
  }
  func.func @transform_0(%arg0: i32) -> (i32, i32) {
    %c0_i32 = arith.constant 0 : i32
    %c0_i32_0 = arith.constant 0 : i32
    return %arg0, %c0_i32 : i32, i32
  }
  func.func @transform_1(%arg0: i32) -> (i32, i32) {
    %c0_i32 = arith.constant 0 : i32
    %c0_i32_0 = arith.constant 0 : i32
    %c0_i32_1 = arith.constant 0 : i32
    return %c0_i32, %c0_i32_0 : i32, i32
  }
  func.func @transform_2(%arg0: i32) -> (i32, i32) {
    %c0_i32 = arith.constant 0 : i32
    %c0_i32_0 = arith.constant 0 : i32
    %c0_i32_1 = arith.constant 0 : i32
    return %c0_i32, %c0_i32_0 : i32, i32
  }
  func.func @transform_3(%arg0: i32) -> (i32, i32) {
    %c0_i32 = arith.constant 0 : i32
    %c0_i32_0 = arith.constant 0 : i32
    return %arg0, %c0_i32 : i32, i32
  }
}

</mosaic_0001>

<bundles_post_ra>
// kernel: a_call__.9
= control target key start
LH: loop header
LB: loop body
LE: loop exit
PB: predicated region body
PF: predicated region fallthrough
CT: control target
= control target key end

     0   :  { %s162_s0 = inlined_call_operand.vmem [shape: f32[16,32], index: 0, kind: input, shape index: {}]   ;;  %s163_s1 = inlined_call_operand.vmem [shape: f32[32,32], index: 1, kind: input, shape index: {}]   ;;  %s164_s2 = inlined_call_operand.vmem [shape: f32[1,32], index: 2, kind: input, shape index: {}]   ;;  %s165_s3 = inlined_call_operand.hbm [shape: f32[16,32], index: 3, kind: output, shape index: {}]  }
   0x1   :  { %v20_v0 = vld [vmem:[%s163_s1 + $0x18] sm:$0xff]  ;;  %v19_v1 = vld [vmem:[%s163_s1 + $0x10] sm:$0xff]  ;;  %v18_v2 = vld [vmem:[%s163_s1 + $0x8] sm:$0xff] }
   0x2   :  { %44 = vmatpush.msra.mxu0 %v20_v0  ;;  %77 = vmatpush.msra.mxu1 %v20_v0 }
   0x3   :  { %8 = vsyncpa [#allocation3], 0  ;;  %v17_v3 = vld [vmem:[%s163_s1] sm:$0xff]  ;;  %vm25_vm0 = vcmask 261120   ;;  %v16_v5 = vld [vmem:[%s162_s0 + $0x8] sm:$0xff]  ;;  %s111_s1 = smov [#allocation2]  }
   0x4   :  { %45 = vmatpush.msra.mxu0 %v19_v1  ;;  %78 = vmatpush.msra.mxu1 %v19_v1  ;;  %v15_v4 = vld [vmem:[%s162_s0] sm:$0xff]  ;;  %s61_s26 = sshll.u32 %s111_s1, 4  ;;  %s63_s29 = sshll.u32 %s165_s3, 4  ;;  %s62_s26 = int_to_ptr.vmem [resolvable:$true] %s61_s26  ;;  %s64_s29 = int_to_ptr.hbm [resolvable:$true] %s63_s29 }
   0x5   :  { %v84_v6 = vld [vmem:[%s164_s2] ss:$0 sm:$0xff]  ;;  %s112_s0 = smov 128   ;;  %s113_s30 = smov 8  }
   0x6   :  { %46 = vmatpush.msra.mxu0 %v18_v2  ;;  %79 = vmatpush.msra.mxu1 %v18_v2 }
   0x8   :  { %47 = vmatpush.msra.mxu0 %v17_v3  ;;  %80 = vmatpush.msra.mxu1 %v17_v3 }
   0x9   :  { %75 = vmatmul.msk.f32.vlgmr.msra.gmra.mxu0 %vm25_vm0, %v15_v4  ;;  %76 = vmatmul.msk.f32.vlgmr.msra.gmra.mxu1 %vm25_vm0, %v16_v5 }
  0x86   :  { %v49_v7 = vpop.f32.mrf.mxu0  ;;  %v52_v8 = vpop.f32.mrf.mxu1 }
  0x87   :  { %v50_v9 = vadd.f32 %v84_v6, %v49_v7  ;;  %v53_v10 = vadd.f32 %v84_v6, %v52_v8 }
  0x89   :  { %55 = vst.msk [vmem:[#allocation2] sm:$0xff] %vm25_vm0, %v50_v9 }
  0x8a   :  { %56 = vst.msk [vmem:[#allocation2 + $0x8] sm:$0xff] %vm25_vm0, %v53_v10 }
  0x8b   :  { %69 = dma.vmem_to_hbm [thread:$0]  %s62_s26, 256, %s64_s29, [#allocation3], %s112_s0, %s112_s0, %s113_s30  }
  0x8c   :  { %109 = dma.done.wait [#allocation3], 256  }
  0x8d   :  { %110 = vsyncadd [#allocation3], 4294967040 }
  0x8e   :  { %74 = vsyncpa [#allocation3], 1 }

// kernel: a_call__.8
= control target key start
LH: loop header
LB: loop body
LE: loop exit
PB: predicated region body
PF: predicated region fallthrough
CT: control target
= control target key end

     0   :  { %s573_s12 = smov 0   ;;  %s575_s13 = smov 0   ;;  %s630_s0 = inlined_call_operand.vmem [shape: f32[8,8,8], index: 0, kind: input, shape index: {}]   ;;  %s631_s1 = inlined_call_operand.vmem [shape: f32[8,8,8], index: 1, kind: input, shape index: {}]   ;;  %s632_s2 = inlined_call_operand.vmem [shape: f32[8,8,8], index: 2, kind: input, shape index: {}]   ;;  %s633_s3 = inlined_call_operand.vmem [shape: f32[8,8,8], index: 3, kind: output, shape index: {}]  }
   0x1   :  { %s577_s14 = smov 0  }
   0x2 LB: > { %s32_s15 = sadd.s32 1, %s544_s13  ;;  %p480_p0 = scmp.ge.s32.totalorder %s548_s14, 1  ;;  %s548_s14 = sphi %s577_s14, %s13_s14   ;;  %s544_s13 = sphi %s575_s13, %s635_s13   ;;  %s540_s12 = sphi %s573_s12, %s634_s12  }
   0x3   : > { %p34_p1 = scmp.ge.s32.totalorder %s32_s15, 8  ;;  %p190_p2 = scmp.lt.s32.totalorder %s548_s14, 9 }
   0x5   : > { %s637_s15 = smov (%p34_p1, %s32_s15), 0  ;;  %p191_p3 = pnand %p480_p0, %p190_p2 }
   0x6   : > { %p232_p4 = scmp.lt.s32.totalorder (!%p191_p3), %s540_s12, 7 }
   0x7   : > { %194 = sbr.rel (%p191_p3) target bundleno = 618 (0x26a), region = 32 }
   0xc   : > { %s639_s12 = smov (!%p232_p4, %s540_s12), 7  ;;  %vm267_vm0 = vcmask 64512   ;;  %vm264_vm1 = vcmask 7168   ;;  %v550_v2 = vmov -inf   ;;  %v551_v5 = vmov 0  }
   0xd   : > { %s591_s16 = sshll.u32 %s639_s12, 3  ;;  %265 = vst.msk [vmem:[#allocation2] sm:$0xff] %vm264_vm1, %v550_v2  ;;  %517 = vset.pattern.permute.xlu0 %v551_v5  ;;  %518 = vset.pattern.permute.xlu1 %v551_v5  ;;  %v552_v6 = vmov 0.0  }
   0xe   : > { %s245_s19 = scalar_lea.vmem %s631_s1, %s591_s16  ;;  %s238_s22 = scalar_lea.vmem %s630_s0, %s591_s16  ;;  %519 = vset.pattern.permute.xlu2 %v551_v5  ;;  %266 = vst.msk [vmem:[#allocation3] sm:$0xff] %vm264_vm1, %v552_v6 }
   0xf   : > { %v270_v0 = vld [vmem:[%s245_s19] sm:$0xff]  ;;  %268 = vst.msk [vmem:[#allocation4] sm:$0xff] %vm267_vm0, %v552_v6  ;;  %s252_s25 = scalar_lea.vmem %s632_s2, %s591_s16  ;;  %s259_s28 = scalar_lea.vmem %s633_s3, %s591_s16 }
  0x10   : > { %485 = vmatpush.xpose.msk.msra.mxu0 %vm267_vm0, %v270_v0  ;;  %v269_v1 = vld [vmem:[%s238_s22] sm:$0xff] }
  0x11   : > { %v271_v11 = vld [vmem:[%s252_s25] sm:$0xff] }
  0x12   : > { %348 = vmatpush.msra.mxu1 %v271_v11 }
  0x13   : > { %486 = vmatmul.msk.f32.vlgmr.msra.gmra.mxu0 %vm267_vm0, %v269_v1 }
  0x14   : > { %v299_v7 = vld [vmem:[#allocation2] sm:$0xff] }
  0x15   : > { %v315_v19 = vld [vmem:[#allocation3] sm:$0xff] }
  0x16   : > { %v323_v25 = vld [vmem:[#allocation4] sm:$0xff] }
  0x90   : > { %v296_v3 = vpop.f32.mrf.mxu0 }
  0x91   : > { %v300_v4 = vsel %vm267_vm0, %v296_v3, -inf }
  0x92   : > { %301 = vmax.xlane.f32.xlu0 %v300_v4 }
 0x105   : > { %v302_v8 = vpop.xlane.xlu0 %301 }
 0x106   : > { %v303_v9 = vmax.f32 %v299_v7, %v302_v8 }
 0x108   : > { %v304_v10 = vsub.f32 %v299_v7, %v303_v9  ;;  %355 = vst.msk [vmem:[#allocation2] sm:$0xff] %vm264_vm1, %v303_v9  ;;  %309 = vperm.xlu0 %517, %v303_v9  }
 0x10a   : > { %v305_v17 = vmul.f32 1.442695, %v304_v10 }
 0x17a   : > { %v310_v12 = vpop.permute.xlu0 %309 }
 0x17b   : > { %v312_v13 = vsub.f32 %v296_v3, %v310_v12 }
 0x17d   : > { %v313_v14 = vmul.f32 1.442695, %v312_v13 }
 0x17f   : > { %520 = vpow2.f32 %v313_v14 }
 0x180   : > { %522 = vpow2.f32 %v305_v17 }
 0x185   : > { %v521_v15 = vpop.eup %520 }
 0x186   : > { %487 = vmatmul.msk.f32.vlgmr.msra.gmra.mxu1 %vm267_vm0, %v521_v15  ;;  %v317_v16 = vsel %vm267_vm0, %v521_v15, 0.0  ;;  %v523_v18 = vpop.eup %522 }
 0x187   : > { %318 = vadd.xlane.f32.xlu1 %v317_v16  ;;  %v316_v20 = vmul.f32 %v523_v18, %v315_v19 }
 0x1a0   : > { %326 = vperm.xlu1 %518, %v523_v18  }
 0x1fa   : > { %v319_v21 = vpop.xlane.xlu1 %318 }
 0x1fb   : > { %v320_v22 = vadd.f32 %v319_v21, %v316_v20 }
 0x1fd   : > { %322 = vst.msk [vmem:[#allocation3] sm:$0xff] %vm264_vm1, %v320_v22 }
 0x203   : > { %v350_v28 = vpop.f32.mrf.mxu1 }
 0x204   : > { %v360_v23 = vld [vmem:[#allocation3] sm:$0xff] }
 0x205   : > { %524 = vrcp.f32 %v360_v23 }
 0x20b   : > { %v525_v24 = vpop.eup %524 }
 0x20c   : > { %364 = vperm.xlu2 %519, %v525_v24  }
 0x212   : > { %v327_v26 = vpop.permute.xlu1 %326 }
 0x213   : > { %v329_v27 = vmul.f32 %v327_v26, %v323_v25 }
 0x215   : > { %v353_v29 = vadd.f32 %v350_v28, %v329_v27 }
 0x217   : > { %354 = vst.msk [vmem:[#allocation4] sm:$0xff] %vm267_vm0, %v353_v29 }
 0x21e   : > { %v359_v30 = vld [vmem:[#allocation4] sm:$0xff] }
 0x266   : > { %v365_v31 = vpop.permute.xlu2 %364 }
 0x267   : > { %v367_v32 = vmul.f32 %v365_v31, %v359_v30 }
 0x269   : > { %368 = vst.msk [vmem:[%s259_s28] sm:$0xff] %vm267_vm0, %v367_v32 }
 0x26a PF: > { %s13_s14 = sadd.s32 1, %s548_s14   ;;  %s634_s12 = smov %s544_s13 }
 0x26b   : > { %p10_p5 = scmp.ge.s32.totalorder %s13_s14, 10   ;;  %s635_s13 = smov %s637_s15 }
 0x26d   :  { %12 = sbr.rel (!%p10_p5) target bundleno = 2 (0x2), region = 76 }

// kernel: a_call__.5
= control target key start
LH: loop header
LB: loop body
LE: loop exit
PB: predicated region body
PF: predicated region fallthrough
CT: control target
= control target key end

     0   :  { %8 = vsyncpa [#allocation3], 0  ;;  %s196_s0 = inlined_call_operand.hbm [shape: f32[16,32], index: 0, kind: input, shape index: {}]   ;;  %s197_s1 = inlined_call_operand.hbm [shape: f32[32,32], index: 1, kind: input, shape index: {}]   ;;  %s198_s2 = inlined_call_operand.vmem [shape: f32[1,32], index: 2, kind: input, shape index: {}]   ;;  %s199_s3 = inlined_call_operand.vmem [shape: f32[16,32], index: 3, kind: output, shape index: {}]  }
   0x1   :  { %s14_s14 = sshll.u32 %s196_s0, 4  ;;  %s15_s14 = int_to_ptr.hbm [resolvable:$true] %s14_s14 }
   0x2   :  { %9 = vsyncpa [#allocation5], 0  ;;  %s157_s15 = smov [#allocation2]   ;;  %s27_s19 = sshll.u32 %s197_s1, 4  ;;  %s28_s19 = int_to_ptr.hbm [resolvable:$true] %s27_s19 }
   0x3   :  { %s16_s16 = sshll.u32 %s157_s15, 4  ;;  %s158_s20 = smov 128   ;;  %s17_s16 = int_to_ptr.vmem [resolvable:$true] %s16_s16 }
   0x4   :  { %s159_s21 = smov 8   ;;  %s160_s22 = smov [#allocation4]  }
   0x5   :  { %22 = dma.hbm_to_vmem [thread:$0]  %s15_s14, 256, %s17_s16, [#allocation3], %s158_s20, %s158_s20, %s159_s21  }
   0x6   :  { %s29_s23 = sshll.u32 %s160_s22, 4  ;;  %s30_s23 = int_to_ptr.vmem [resolvable:$true] %s29_s23 }
   0x7   :  { %35 = dma.hbm_to_vmem [thread:$0]  %s28_s19, 512, %s30_s23, [#allocation5], %s158_s20, %s158_s20, %s159_s21  }
   0x8   :  { %153 = dma.done.wait [#allocation3], 256  }
   0x9   :  { %154 = vsyncadd [#allocation3], 4294967040 }
   0xa   :  { %155 = dma.done.wait [#allocation5], 512  }
   0xb   :  { %156 = vsyncadd [#allocation5], 4294966784  ;;  %v51_v0 = vld [vmem:[#allocation4 + $0x18] sm:$0xff]  ;;  %v50_v1 = vld [vmem:[#allocation4 + $0x10] sm:$0xff]  ;;  %vm56_vm0 = vcmask 261120  }
   0xc   :  { %75 = vmatpush.msra.mxu0 %v51_v0  ;;  %96 = vmatpush.msra.mxu1 %v51_v0  ;;  %v49_v2 = vld [vmem:[#allocation4 + $0x8] sm:$0xff]  ;;  %v48_v3 = vld [vmem:[#allocation4] sm:$0xff]  ;;  %v46_v4 = vld [vmem:[#allocation2] sm:$0xff] }
   0xd   :  { %v47_v5 = vld [vmem:[#allocation2 + $0x8] sm:$0xff]  ;;  %v104_v6 = vld [vmem:[%s198_s2] ss:$0 sm:$0xff] }
   0xe   :  { %76 = vmatpush.msra.mxu0 %v50_v1  ;;  %97 = vmatpush.msra.mxu1 %v50_v1 }
  0x10   :  { %77 = vmatpush.msra.mxu0 %v49_v2  ;;  %98 = vmatpush.msra.mxu1 %v49_v2 }
  0x12   :  { %78 = vmatpush.msra.mxu0 %v48_v3  ;;  %99 = vmatpush.msra.mxu1 %v48_v3 }
  0x13   :  { %94 = vmatmul.msk.f32.vlgmr.msra.gmra.mxu0 %vm56_vm0, %v46_v4  ;;  %95 = vmatmul.msk.f32.vlgmr.msra.gmra.mxu1 %vm56_vm0, %v47_v5 }
  0x90   :  { %v80_v7 = vpop.f32.mrf.mxu0  ;;  %v83_v8 = vpop.f32.mrf.mxu1 }
  0x91   :  { %v81_v9 = vadd.f32 %v104_v6, %v80_v7  ;;  %v84_v10 = vadd.f32 %v104_v6, %v83_v8 }
  0x93   :  { %86 = vst.msk [vmem:[%s199_s3] sm:$0xff] %vm56_vm0, %v81_v9 }
  0x94   :  { %87 = vst.msk [vmem:[%s199_s3 + $0x8] sm:$0xff] %vm56_vm0, %v84_v10 }
  0x95   :  { %92 = vsyncpa [#allocation3], 1 }
  0x96   :  { %93 = vsyncpa [#allocation5], 1 }

</bundles_post_ra>
